<compile_context>
chip_gen: v7x
topology: tpu7x:2x2x1
jax: 0.10.0
libtpu: 0.0.40
codegen_flags: <defaults>
</compile_context>

<pallas_src>
from functools import partial

import jax
import jax.numpy as jnp
from jax.experimental import pallas as pl
from jax.experimental.pallas import tpu as pltpu


def _loss_kernel(pred_ref, gt_ref, out_ref, acc_ref, cm_ref, rm_ref,
                 *, w, hw, tb, nblk, nc_rows, inv_n, ragged):
    """Processes a (TB, HW) block of flattened image slices.

    Flattened layout: row = one (n, c) image slice, lane k = i*W + j.
      grad_x src: shift-by-1 along lanes, zeroed where k % W == 0
      grad_y src: shift-by-W along lanes, zeroed where k <  W
    """
    i = pl.program_id(1)

    @pl.when(i == 0)
    def _():
        acc_ref[...] = jnp.zeros_like(acc_ref)
        lane = jax.lax.broadcasted_iota(jnp.int32, (1, hw), 1)
        cm_ref[...] = ((lane % w) != 0).astype(jnp.float32)
        rm_ref[...] = (lane >= w).astype(jnp.float32)

    p = pred_ref[...].astype(jnp.float32)   # (TB, HW)
    g = gt_ref[...].astype(jnp.float32)

    cm = cm_ref[...]   # (1, HW) cached lane masks (0.0 / 1.0)
    rm = rm_ref[...]

    def grad_l1(x):
        x_l = pltpu.roll(x, shift=1, axis=1) * cm   # x[i, j-1], 0 at j == 0
        x_u = pltpu.roll(x, shift=w, axis=1) * rm   # x[i-1, j], 0 at i == 0
        return jnp.abs(x_l - x) + jnp.abs(x_u - x)

    d = p - g
    contrib = d * d + jnp.abs(grad_l1(p) - grad_l1(g))   # (TB, HW)

    if ragged:
        # Rows beyond the true N*C extent (padded / clamped blocks) are zeroed.
        row0 = (pl.program_id(0) * nblk + i) * tb
        rows = row0 + jax.lax.broadcasted_iota(jnp.int32, (tb, 1), 0)
        contrib = jnp.where(rows < nc_rows, contrib, 0.0)

    if tb % 8 == 0:
        # Fold to an (8, HW) partial with pure VPU adds; tiny accumulator RMW.
        acc_ref[...] += contrib.reshape(tb // 8, 8, hw).sum(axis=0)
    else:
        acc_ref[...] += contrib   # only when N*C < 8 (TB == N*C)

    @pl.when(i == pl.num_programs(1) - 1)
    def _():
        s = jnp.sum(acc_ref[...]) * inv_n
        out_ref[...] = jnp.zeros(out_ref.shape, jnp.float32) + s


def loss_basic(pred, gt, *, n_cores=1):
    """LossBasic.forward(pred, ground_truth) for NCHW float inputs.

    n_cores=1 for single-TensorCore chips (v5e/v6e); pass 2 on megacore/v7x.
    """
    assert pred.shape == gt.shape
    N, C, H, W = pred.shape
    NC, HW = N * C, H * W
    n_total = NC * HW

    p2 = pred.reshape(NC, HW)   # metadata-only reshape, no HBM copy
    g2 = gt.reshape(NC, HW)
    itemsize = jnp.dtype(pred.dtype).itemsize

    # ---- generation-aware VMEM budget / block sizing ----
    try:
        vmem_cap = int(pltpu.get_tpu_info().vmem_capacity_bytes)
    except Exception:
        vmem_cap = 64 * 1024 * 1024   # conservative (v7x-sized) fallback
    vmem_limit = int(max(32 * 1024 * 1024,
                         min(vmem_cap * 3 // 4, 96 * 1024 * 1024)))
    budget = vmem_limit // 2
    # 2 inputs x 2 buffers at native dtype + ~6 block-sized f32 temporaries.
    bytes_per_elem = 4 * itemsize + 6 * 4
    max_elems = min(budget // bytes_per_elem, 1 << 20)
    tb_cap = max(8, (max_elems // HW) // 8 * 8)

    # ---- core / block layout (no padded copies of the inputs) ----
    n_cores = max(1, min(n_cores, NC // 8)) if NC >= 8 else 1
    per_core = -(-NC // n_cores)
    if NC >= 8:
        TB = int(min(tb_cap, max(8, (per_core // 8) * 8)))   # multiple of 8, <= NC
    else:
        TB = NC   # block dim == full array dim when fewer than 8 slices
    nblk = -(-per_core // TB)
    last_blk = -(-NC // TB) - 1                  # last block with >=1 valid row
    ragged = (n_cores * nblk * TB) != NC
    acc_rows = 8 if TB % 8 == 0 else TB

    kernel = partial(_loss_kernel, w=W, hw=HW, tb=TB, nblk=nblk,
                     nc_rows=NC, inv_n=1.0 / float(n_total), ragged=ragged)

    def in_map(c, i):
        # Clamp so a fully-out-of-range logical block still DMAs in-bounds data;
        # its rows are zeroed by the in-kernel validity mask.
        return (jnp.minimum(c * nblk + i, last_blk), 0)

    partials = pl.pallas_call(
        kernel,
        out_shape=jax.ShapeDtypeStruct((n_cores, 8, 128), jnp.float32),
        grid_spec=pltpu.PrefetchScalarGridSpec(
            num_scalar_prefetch=0,
            grid=(n_cores, nblk),
            in_specs=[
                pl.BlockSpec((TB, HW), in_map),
                pl.BlockSpec((TB, HW), in_map),
            ],
            out_specs=pl.BlockSpec((1, 8, 128), lambda c, i: (c, 0, 0)),
            scratch_shapes=[
                pltpu.VMEM((acc_rows, HW), jnp.float32),   # small accumulator
                pltpu.VMEM((1, HW), jnp.float32),          # cached column mask
                pltpu.VMEM((1, HW), jnp.float32),          # cached row mask
            ],
        ),
        compiler_params=pltpu.CompilerParams(
            dimension_semantics=("parallel", "arbitrary"),
            vmem_limit_bytes=vmem_limit,
        ),
    )(p2, g2)

    # One lane-dense partial per core; fold them and return the scalar.
    return jnp.sum(partials[:, 0, 0])


def _ref_loss(pred, gt):
    """Pure-JAX reference matching the PyTorch module exactly."""
    def grad(x):
        xl = jnp.pad(x, ((0, 0), (0, 0), (0, 0), (1, 0)))[..., :, :-1]
        xu = jnp.pad(x, ((0, 0), (0, 0), (1, 0), (0, 0)))[..., :-1, :]
        return jnp.abs(xl - x) + jnp.abs(xu - x)

    mse = jnp.mean((pred - gt) ** 2)
    l1 = jnp.mean(jnp.abs(grad(pred) - grad(gt)))
    return mse + l1


if __name__ == "__main__":
    key = jax.random.PRNGKey(0)
    k1, k2 = jax.random.split(key)
    # Small NCHW shapes: batch=2, channels=4, spatial=16x16.
    pred = jax.random.normal(k1, (2, 4, 16, 16), dtype=jnp.float32)
    gt = jax.random.normal(k2, (2, 4, 16, 16), dtype=jnp.float32)

    out = loss_basic(pred, gt)
    out = jax.block_until_ready(out)

    ref = _ref_loss(pred, gt)
    assert jnp.allclose(out, ref, rtol=1e-4, atol=1e-5), (float(out), float(ref))
    print("KERNEL_OK")
</pallas_src>

<mosaic_0001>
module attributes {stable_mosaic.version = 11 : i64} {
  func.func @_loss_kernel(%arg0: i32, %arg1: i32, %arg2: memref<8x256xf32, #tpu.memory_space<vmem>>, %arg3: memref<8x256xf32, #tpu.memory_space<vmem>>, %arg4: memref<1x8x128xf32, #tpu.memory_space<vmem>>, %arg5: memref<8x256xf32, #tpu.memory_space<vmem>>, %arg6: memref<1x256xf32, #tpu.memory_space<vmem>>, %arg7: memref<1x256xf32, #tpu.memory_space<vmem>>) attributes {dimension_semantics = [#tpu.dimension_semantics<parallel>, #tpu.dimension_semantics<arbitrary>], iteration_bounds = array<i64: 1, 1>, scalar_prefetch = 0 : i64, scratch_operands = 3 : i64, tpu.core_type = #tpu.core_type<tc>, window_params = [{transform_indices = @transform_0, window_bounds = array<i64: 8, 256>}, {transform_indices = @transform_1, window_bounds = array<i64: 8, 256>}, {transform_indices = @transform_2, window_bounds = array<i64: 1, 8, 128>}]} {
    %c0_i32 = arith.constant 0 : i32
    %0 = arith.cmpi eq, %arg1, %c0_i32 : i32
    %1 = arith.extui %0 : i1 to i32
    %c0_i32_0 = arith.constant 0 : i32
    %2 = arith.cmpi ne, %1, %c0_i32_0 : i32
    scf.if %2 {
      %cst_16 = arith.constant 0.000000e+00 : f32
      %42 = vector.broadcast %cst_16 : f32 to vector<8x256xf32>
      %c0_17 = arith.constant 0 : index
      %c0_18 = arith.constant 0 : index
      %43 = vector.load %arg5[%c0_17, %c0_18] : memref<8x256xf32, #tpu.memory_space<vmem>>, vector<8x256xf32>
      tpu.vector_store %arg5[%c0_17, %c0_18], %42 {strides = array<i32>} : memref<8x256xf32, #tpu.memory_space<vmem>>, vector<8x256xf32>,
      %44 = tpu.iota {dimensions = array<i32: 1>} : vector<1x256xi32>
      %c16_i32_19 = arith.constant 16 : i32
      %c0_i32_20 = arith.constant 0 : i32
      %45 = arith.cmpi eq, %c16_i32_19, %c0_i32_20 : i32
      %c1_i32_21 = arith.constant 1 : i32
      %46 = arith.select %45, %c1_i32_21, %c16_i32_19 : i32
      %47 = vector.broadcast %46 : i32 to vector<1x256xi32>
      %48 = arith.remsi %44, %47 : vector<1x256xi32>
      %c0_i32_22 = arith.constant 0 : i32
      %49 = vector.broadcast %c0_i32_22 : i32 to vector<1x256xi32>
      %50 = arith.cmpi ne, %48, %49 : vector<1x256xi32>
      %c0_i32_23 = arith.constant 0 : i32
      %51 = vector.broadcast %c0_i32_23 : i32 to vector<1x256xi32>
      %52 = arith.cmpi slt, %48, %51 : vector<1x256xi32>
      %c0_i32_24 = arith.constant 0 : i32
      %53 = arith.cmpi slt, %46, %c0_i32_24 : i32
      %54 = vector.broadcast %53 : i1 to vector<1x256xi1>
      %55 = vector.broadcast %54 : vector<1x256xi1> to vector<1x256xi1>
      %56 = arith.xori %52, %55 : vector<1x256xi1>
      %57 = arith.andi %56, %50 : vector<1x256xi1>
      %58 = vector.broadcast %46 : i32 to vector<1x256xi32>
      %59 = arith.addi %48, %58 : vector<1x256xi32>
      %60 = arith.select %57, %59, %48 : vector<1x256xi1>, vector<1x256xi32>
      %c0_i32_25 = arith.constant 0 : i32
      %61 = vector.broadcast %c0_i32_25 : i32 to vector<1x256xi32>
      %62 = arith.cmpi ne, %60, %61 : vector<1x256xi32>
      %63 = arith.extui %62 : vector<1x256xi1> to vector<1x256xi32>
      %64 = arith.sitofp %63 : vector<1x256xi32> to vector<1x256xf32>
      %c0_26 = arith.constant 0 : index
      %c0_27 = arith.constant 0 : index
      %65 = vector.load %arg6[%c0_26, %c0_27] : memref<1x256xf32, #tpu.memory_space<vmem>>, vector<1x256xf32>
      tpu.vector_store %arg6[%c0_26, %c0_27], %64 {strides = array<i32>} : memref<1x256xf32, #tpu.memory_space<vmem>>, vector<1x256xf32>,
      %c16_i32_28 = arith.constant 16 : i32
      %66 = vector.broadcast %c16_i32_28 : i32 to vector<1x256xi32>
      %67 = arith.cmpi sge, %44, %66 : vector<1x256xi32>
      %68 = arith.extui %67 : vector<1x256xi1> to vector<1x256xi32>
      %69 = arith.sitofp %68 : vector<1x256xi32> to vector<1x256xf32>
      %c0_29 = arith.constant 0 : index
      %c0_30 = arith.constant 0 : index
      %70 = vector.load %arg7[%c0_29, %c0_30] : memref<1x256xf32, #tpu.memory_space<vmem>>, vector<1x256xf32>
      tpu.vector_store %arg7[%c0_29, %c0_30], %69 {strides = array<i32>} : memref<1x256xf32, #tpu.memory_space<vmem>>, vector<1x256xf32>,
    } else {
    }
    %c0 = arith.constant 0 : index
    %c0_1 = arith.constant 0 : index
    %3 = vector.load %arg2[%c0, %c0_1] : memref<8x256xf32, #tpu.memory_space<vmem>>, vector<8x256xf32>
    %c0_2 = arith.constant 0 : index
    %c0_3 = arith.constant 0 : index
    %4 = vector.load %arg3[%c0_2, %c0_3] : memref<8x256xf32, #tpu.memory_space<vmem>>, vector<8x256xf32>
    %c0_4 = arith.constant 0 : index
    %c0_5 = arith.constant 0 : index
    %5 = vector.load %arg6[%c0_4, %c0_5] : memref<1x256xf32, #tpu.memory_space<vmem>>, vector<1x256xf32>
    %c0_6 = arith.constant 0 : index
    %c0_7 = arith.constant 0 : index
    %6 = vector.load %arg7[%c0_6, %c0_7] : memref<1x256xf32, #tpu.memory_space<vmem>>, vector<1x256xf32>
    %7 = arith.subf %3, %4 : vector<8x256xf32>
    %8 = arith.mulf %7, %7 : vector<8x256xf32>
    %c1_i32 = arith.constant 1 : i32
    %9 = tpu.dynamic_rotate %3 by %c1_i32 dim 1 : vector<8x256xf32>, i32 -> vector<8x256xf32>
    %10 = vector.broadcast %5 : vector<1x256xf32> to vector<8x256xf32>
    %11 = arith.mulf %9, %10 : vector<8x256xf32>
    %c16_i32 = arith.constant 16 : i32
    %12 = tpu.dynamic_rotate %3 by %c16_i32 dim 1 : vector<8x256xf32>, i32 -> vector<8x256xf32>
    %13 = vector.broadcast %6 : vector<1x256xf32> to vector<8x256xf32>
    %14 = arith.mulf %12, %13 : vector<8x256xf32>
    %15 = arith.subf %11, %3 : vector<8x256xf32>
    %16 = math.absf %15 : vector<8x256xf32>
    %17 = arith.subf %14, %3 : vector<8x256xf32>
    %18 = math.absf %17 : vector<8x256xf32>
    %19 = arith.addf %16, %18 : vector<8x256xf32>
    %c1_i32_8 = arith.constant 1 : i32
    %20 = tpu.dynamic_rotate %4 by %c1_i32_8 dim 1 : vector<8x256xf32>, i32 -> vector<8x256xf32>
    %21 = vector.broadcast %5 : vector<1x256xf32> to vector<8x256xf32>
    %22 = arith.mulf %20, %21 : vector<8x256xf32>
    %c16_i32_9 = arith.constant 16 : i32
    %23 = tpu.dynamic_rotate %4 by %c16_i32_9 dim 1 : vector<8x256xf32>, i32 -> vector<8x256xf32>
    %24 = vector.broadcast %6 : vector<1x256xf32> to vector<8x256xf32>
    %25 = arith.mulf %23, %24 : vector<8x256xf32>
    %26 = arith.subf %22, %4 : vector<8x256xf32>
    %27 = math.absf %26 : vector<8x256xf32>
    %28 = arith.subf %25, %4 : vector<8x256xf32>
    %29 = math.absf %28 : vector<8x256xf32>
    %30 = arith.addf %27, %29 : vector<8x256xf32>
    %31 = arith.subf %19, %30 : vector<8x256xf32>
    %32 = math.absf %31 : vector<8x256xf32>
    %33 = arith.addf %8, %32 : vector<8x256xf32>
    %c0_10 = arith.constant 0 : index
    %c0_11 = arith.constant 0 : index
    %34 = vector.load %arg5[%c0_10, %c0_11] : memref<8x256xf32, #tpu.memory_space<vmem>>, vector<8x256xf32>
    %35 = vector.shape_cast %33 : vector<8x256xf32> to vector<1x8x256xf32>
    %cst = arith.constant dense<0.000000e+00> : vector<8x256xf32>
    %36 = vector.multi_reduction <add>, %35, %cst [0] : vector<1x8x256xf32> to vector<8x256xf32>
    %37 = arith.addf %34, %36 : vector<8x256xf32>
    %c0_12 = arith.constant 0 : index
    %c0_13 = arith.constant 0 : index
    %38 = vector.load %arg5[%c0_12, %c0_13] : memref<8x256xf32, #tpu.memory_space<vmem>>, vector<8x256xf32>
    tpu.vector_store %arg5[%c0_12, %c0_13], %37 {strides = array<i32>} : memref<8x256xf32, #tpu.memory_space<vmem>>, vector<8x256xf32>,
    %c0_i32_14 = arith.constant 0 : i32
    %39 = arith.cmpi eq, %arg1, %c0_i32_14 : i32
    %40 = arith.extui %39 : i1 to i32
    %c0_i32_15 = arith.constant 0 : i32
    %41 = arith.cmpi ne, %40, %c0_i32_15 : i32
    scf.if %41 {
      %c0_16 = arith.constant 0 : index
      %c0_17 = arith.constant 0 : index
      %42 = vector.load %arg5[%c0_16, %c0_17] : memref<8x256xf32, #tpu.memory_space<vmem>>, vector<8x256xf32>
      %43 = vector.shape_cast %42 : vector<8x256xf32> to vector<1x8x256xf32>
      %cst_18 = arith.constant dense<0.000000e+00> : vector<1xf32>
      %44 = vector.multi_reduction <add>, %43, %cst_18 [1, 2] : vector<1x8x256xf32> to vector<1xf32>
      %45 = vector.shape_cast %44 : vector<1xf32> to vector<1x1x1xf32>
      %46 = vector.extract %45[0, 0, 0] : f32 from vector<1x1x1xf32>
      %cst_19 = arith.constant 4.8828125E-4 : f32
      %47 = arith.mulf %46, %cst_19 : f32
      %cst_20 = arith.constant 0.000000e+00 : f32
      %48 = vector.broadcast %cst_20 : f32 to vector<1x8x128xf32>
      %49 = vector.broadcast %47 : f32 to vector<1x8x128xf32>
      %50 = arith.addf %48, %49 : vector<1x8x128xf32>
      %c0_21 = arith.constant 0 : index
      %c0_22 = arith.constant 0 : index
      %c0_23 = arith.constant 0 : index
      %51 = vector.load %arg4[%c0_21, %c0_22, %c0_23] : memref<1x8x128xf32, #tpu.memory_space<vmem>>, vector<1x8x128xf32>
      tpu.vector_store %arg4[%c0_21, %c0_22, %c0_23], %50 {strides = array<i32>} : memref<1x8x128xf32, #tpu.memory_space<vmem>>, vector<1x8x128xf32>,
    } else {
    }
    return
  }
  func.func @transform_0(%arg0: i32, %arg1: i32) -> (i32, i32) {
    %c1_i32 = arith.constant 1 : i32
    %0 = arith.muli %arg0, %c1_i32 : i32
    %1 = arith.addi %0, %arg1 : i32
    %c0_i32 = arith.constant 0 : i32
    %2 = arith.minsi %1, %c0_i32 : i32
    %c0_i32_0 = arith.constant 0 : i32
    %c0_i32_1 = arith.constant 0 : i32
    return %2, %c0_i32_0 : i32, i32
  }
  func.func @transform_1(%arg0: i32, %arg1: i32) -> (i32, i32) {
    %c1_i32 = arith.constant 1 : i32
    %0 = arith.muli %arg0, %c1_i32 : i32
    %1 = arith.addi %0, %arg1 : i32
    %c0_i32 = arith.constant 0 : i32
    %2 = arith.minsi %1, %c0_i32 : i32
    %c0_i32_0 = arith.constant 0 : i32
    %c0_i32_1 = arith.constant 0 : i32
    return %2, %c0_i32_0 : i32, i32
  }
  func.func @transform_2(%arg0: i32, %arg1: i32) -> (i32, i32, i32) {
    %c0_i32 = arith.constant 0 : i32
    %c0_i32_0 = arith.constant 0 : i32
    %c0_i32_1 = arith.constant 0 : i32
    return %arg0, %c0_i32, %c0_i32_0 : i32, i32, i32
  }
}

</mosaic_0001>

<bundles_post_ra>
// kernel: tpu_custom_call.1
= control target key start
LH: loop header
LB: loop body
LE: loop exit
PB: predicated region body
PF: predicated region fallthrough
CT: control target
= control target key end

     0   :  { %7 = vsyncpa [#allocation6], 0  ;;  %s463_s0 = inlined_call_operand.hbm [shape: f32[8,256], index: 0, kind: input, shape index: {}]   ;;  %s464_s1 = inlined_call_operand.hbm [shape: f32[8,256], index: 1, kind: input, shape index: {}]   ;;  %s465_s2 = inlined_call_operand.hbm [shape: f32[1,8,128], index: 2, kind: output, shape index: {}]  }
   0x1   :  { %8 = vsyncpa [#allocation9], 0 }
   0x2   :  { %9 = vsyncpa [#allocation7], 0  ;;  %s367_s9 = smov [#allocation5]   ;;  %s368_s11 = smov [#allocation8]  }
   0x3   :  { %s22_s10 = sshll.u32 %s367_s9, 4  ;;  %s38_s12 = sshll.u32 %s368_s11, 4  ;;  %s23_s10 = int_to_ptr.vmem [resolvable:$true] %s22_s10  ;;  %s39_s12 = int_to_ptr.vmem [resolvable:$true] %s38_s12 }
   0x4   :  { %s295_s15 = scalar_lea.hbm %s463_s0, 256 }
   0x5   :  { %p296_p0 = scmp.ne.s32.totalorder %s463_s0, %s295_s15  ;;  %p299_p1 = scmp.lt.u32.totalorder %s295_s15, %s463_s0 }
   0x7   :  { %p301_p2 = pnand %p299_p1, %p296_p0 }
   0x9   :  { %304 = shalt.err (!%p301_p2)
}
   0xa   :  { %s305_s20 = scalar_lea.vmem %s23_s10, 256  ;;  %p310_p4 = scmp.lt.s32.totalorder %s23_s10, %s23_s10 }
   0xb   :  { %p306_p3 = scmp.ne.s32.totalorder %s23_s10, %s305_s20  ;;  %p311_p5 = scmp.lt.s32.totalorder %s305_s20, %s305_s20 }
   0xd   :  { %p312_p6 = por %p311_p5, %p310_p4 }
   0xf   :  { %p313_p7 = pnand %p312_p6, %p306_p3 }
  0x11   :  { %316 = shalt.err (!%p313_p7)
}
  0x12   :  { %25 = dma.hbm_to_vmem [thread:$0]  %s463_s0, 256, %s23_s10, [#allocation6]  }
  0x13   :  { %s317_s25 = scalar_lea.hbm %s464_s1, 256 }
  0x14   :  { %p318_p8 = scmp.ne.s32.totalorder %s464_s1, %s317_s25  ;;  %p321_p9 = scmp.lt.u32.totalorder %s317_s25, %s464_s1 }
  0x16   :  { %p323_p10 = pnand %p321_p9, %p318_p8 }
  0x18   :  { %326 = shalt.err (!%p323_p10)
}
  0x19   :  { %s327_s30 = scalar_lea.vmem %s39_s12, 256  ;;  %p332_p12 = scmp.lt.s32.totalorder %s39_s12, %s39_s12 }
  0x1a   :  { %p328_p11 = scmp.ne.s32.totalorder %s39_s12, %s327_s30  ;;  %p333_p13 = scmp.lt.s32.totalorder %s327_s30, %s327_s30 }
  0x1c   :  { %p334_p0 = por %p333_p13, %p332_p12 }
  0x1e   :  { %p335_p1 = pnand %p334_p0, %p328_p11 }
  0x20   :  { %338 = shalt.err (!%p335_p1)
}
  0x21   :  { %41 = dma.hbm_to_vmem [thread:$0]  %s464_s1, 256, %s39_s12, [#allocation9]  }
  0x22   :  { %361 = dma.done.wait [#allocation6], 256  }
  0x23   :  { %362 = vsyncadd [#allocation6], 4294967040 }
  0x24   :  { %363 = dma.done.wait [#allocation9], 256  }
  0x25   :  { %364 = vsyncadd [#allocation9], 4294967040  ;;  %v60_v0 = vlaneseq  ;;  %v369_v2 = vmov 1966171168   ;;  %v370_v8 = vmov 0.0   ;;  %v371_v12 = vmov 1.0  }
  0x26   :  { %v97_v3 = vunpack.c.l.s4 %v369_v2  ;;  %v419_v14 = vld [vmem:[#allocation5] sm:$0xff]  ;;  %s372_s1 = smov 16   ;;  %s373_s4 = smov 1   ;;  %v423_v17 = vld [vmem:[#allocation5 + $0x8] sm:$0xff]  ;;  %v144_v22 = vld [vmem:[#allocation8 + $0x8] sm:$0xff] }
  0x27   :  { %v414_v1 = vand.u32 127, %v60_v0  ;;  %v100_v4 = vshrl.u32 %v60_v0, 7  ;;  %173 = vrot.lane.b32.xlu1 %v419_v14, %s372_s1  ;;  %151 = vrot.lane.b32.xlu0 %v419_v14, %s373_s4  ;;  %vm113_vm3 = vcmp.lt.s32.totalorder %v60_v0, 256  ;;  %v143_v23 = vld [vmem:[#allocation8] sm:$0xff]  ;;  %s374_s5 = smov [#allocation10]  }
  0x28   :  { %v98_v7 = vunpack.c.0.s8 %v97_v3  ;;  %s268_s6 = sshll.u32 %s374_s5, 4  ;;  %s269_s6 = int_to_ptr.vmem [resolvable:$true] %s268_s6 }
  0x29   :  { %v62_v5 = vadd.s32 128, %v414_v1  ;;  %v67_v6 = vand.u32 15, %v414_v1  ;;  %vm116_vm0 = vcmp.ge.s32.totalorder %v414_v1, 16  ;;  %v163_v25 = vsub.s32 0, %v100_v4  ;;  %s339_s9 = scalar_lea.vmem %s269_s6, 128  ;;  %p344_p3 = scmp.lt.s32.totalorder %s269_s6, %s269_s6 }
  0x2a   :  { %v284_v9 = vsel %vm116_vm0, 1.0, %v370_v8  ;;  %v101_v11 = vsub.s32 %v98_v7, %v100_v4  ;;  %v167_v26 = vsub.s32 1, %v100_v4  ;;  %vm177_vm4 = vcmp.lt.s32.totalorder %v414_v1, 16  ;;  %p340_p2 = scmp.ne.s32.totalorder %s269_s6, %s339_s9  ;;  %p345_p4 = scmp.lt.s32.totalorder %s339_s9, %s339_s9 }
  0x2b   :  { %v74_v10 = vand.u32 15, %v62_v5  ;;  %vm87_vm1 = vcmp.ne.s32.totalorder %v67_v6, 0  ;;  %v124_v13 = vcombine.low %v284_v9, %v371_v12  ;;  %175 = vrot.lane.b32.xlu1 %v423_v17, %s372_s1  ;;  %153 = vrot.lane.b32.xlu0 %v423_v17, %s373_s4  ;;  %vm157_vm5 = vcmp.lt.s32.totalorder %v414_v1, 1 }
  0x2c   :  { %v282_v15 = vsel %vm87_vm1, 1.0, %v370_v8  ;;  %v147_v9 = vsub.f32 %v419_v14, %v143_v23  ;;  %p346_p5 = por %p345_p4, %p344_p3 }
  0x2d   :  { %vm88_vm2 = vcmp.ne.s32.totalorder %v74_v10, 0  ;;  %v131_v16 = vrot.slane %v124_v13, %v101_v11  ;;  %v148_v13 = vsub.f32 %v423_v17, %v144_v22 }
  0x2e   :  { %v283_v18 = vsel %vm88_vm2, 1.0, %v370_v8  ;;  %p347_p6 = pnand %p346_p5, %p340_p2 }
  0x2f   :  { %v95_v19 = vcombine.low %v282_v15, %v283_v18  ;;  %v138_v20 = vrot.slane %v131_v16, %v101_v11  ;;  %205 = vrot.lane.b32.xlu1 %v144_v22, %s373_s4  ;;  %203 = vrot.lane.b32.xlu0 %v143_v23, %s373_s4  ;;  %v149_v18 = vmul.f32 %v147_v9, %v147_v9 }
  0x31   :  { %v102_v21 = vrot.slane %v95_v19, %v101_v11  ;;  %140 = vst.msk [vmem:[#allocation4] sm:$0x3] %vm113_vm3, %v138_v20  ;;  %v150_v19 = vmul.f32 %v148_v13, %v148_v13 }
  0x33   :  { %v109_v24 = vrot.slane %v102_v21, %v101_v11  ;;  %213 = vrot.lane.b32.xlu1 %v144_v22, %s372_s1  ;;  %211 = vrot.lane.b32.xlu0 %v143_v23, %s372_s1 }
  0x35   :  { %115 = vst.msk [vmem:[#allocation3] sm:$0x3] %vm113_vm3, %v109_v24 }
  0x38   :  { %v146_v27 = vld [vmem:[#allocation4] sm:$0x3] }
  0x39   :  { %v184_v31 = vrot.slane %v146_v27, %v163_v25  ;;  %v188_v32 = vrot.slane %v146_v27, %v167_v26 }
  0x3c   :  { %v145_v28 = vld [vmem:[#allocation3] sm:$0x3] }
  0x3d   :  { %v164_v33 = vrot.slane %v145_v28, %v163_v25  ;;  %v168_v34 = vrot.slane %v145_v28, %v167_v26 }
  0x99   :  { %v174_v29 = vpop.permute.xlu1 %173  ;;  %v152_v30 = vpop.permute.xlu0 %151 }
  0x9d   :  { %v176_v35 = vpop.permute.xlu1 %175  ;;  %v154_v36 = vpop.permute.xlu0 %153 }
  0x9e   :  { %v178_v37 = vsel %vm177_vm4, %v174_v29, %v176_v35  ;;  %v179_v38 = vsel %vm177_vm4, %v176_v35, %v174_v29  ;;  %v158_v39 = vsel %vm157_vm5, %v152_v30, %v154_v36  ;;  %v159_v40 = vsel %vm157_vm5, %v154_v36, %v152_v30 }
  0x9f   :  { %v191_v41 = vmul.f32 %v184_v31, %v179_v38  ;;  %v192_v42 = vmul.f32 %v188_v32, %v178_v37  ;;  %v171_v43 = vmul.f32 %v164_v33, %v159_v40  ;;  %v172_v44 = vmul.f32 %v168_v34, %v158_v39 }
  0xa1   :  { %v197_v45 = vsub.f32 %v191_v41, %v419_v14  ;;  %v198_v46 = vsub.f32 %v192_v42, %v423_v17  ;;  %v193_v47 = vsub.f32 %v171_v43, %v419_v14  ;;  %v194_v48 = vsub.f32 %v172_v44, %v423_v17  ;;  %v206_v49 = vpop.permute.xlu1 %205  ;;  %v204_v50 = vpop.permute.xlu0 %203 }
  0xa2   :  { %v207_v51 = vsel %vm157_vm5, %v204_v50, %v206_v49  ;;  %v208_v52 = vsel %vm157_vm5, %v206_v49, %v204_v50 }
  0xa3   :  { %v199_v53 = vand.u32 2147483647, %v197_v45  ;;  %v200_v54 = vand.u32 2147483647, %v198_v46  ;;  %v195_v55 = vand.u32 2147483647, %v193_v47  ;;  %v209_v56 = vmul.f32 %v208_v52, %v164_v33 }
  0xa4   :  { %v196_v57 = vand.u32 2147483647, %v194_v48  ;;  %v210_v58 = vmul.f32 %v207_v51, %v168_v34 }
  0xa5   :  { %v201_v59 = vadd.f32 %v199_v53, %v195_v55  ;;  %v214_v60 = vpop.permute.xlu1 %213  ;;  %v212_v61 = vpop.permute.xlu0 %211  ;;  %v219_v63 = vsub.f32 %v209_v56, %v143_v23 }
  0xa6   :  { %v202_v62 = vadd.f32 %v200_v54, %v196_v57  ;;  %v215_v0 = vsel %vm177_vm4, %v212_v61, %v214_v60  ;;  %v216_v2 = vsel %vm177_vm4, %v214_v60, %v212_v61  ;;  %v220_v3 = vsub.f32 %v210_v58, %v144_v22 }
  0xa7   :  { %v217_v4 = vmul.f32 %v216_v2, %v184_v31  ;;  %v218_v5 = vmul.f32 %v215_v0, %v188_v32  ;;  %v221_v8 = vand.u32 2147483647, %v219_v63 }
  0xa8   :  { %v222_v10 = vand.u32 2147483647, %v220_v3 }
  0xa9   :  { %v223_v6 = vsub.f32 %v217_v4, %v143_v23  ;;  %v224_v7 = vsub.f32 %v218_v5, %v144_v22 }
  0xab   :  { %v225_v11 = vand.u32 2147483647, %v223_v6  ;;  %v226_v12 = vand.u32 2147483647, %v224_v7 }
  0xad   :  { %v227_v15 = vadd.f32 %v225_v11, %v221_v8  ;;  %v228_v16 = vadd.f32 %v226_v12, %v222_v10 }
  0xaf   :  { %v229_v20 = vsub.f32 %v201_v59, %v227_v15  ;;  %v230_v1 = vsub.f32 %v202_v62, %v228_v16 }
  0xb1   :  { %v231_v21 = vand.u32 2147483647, %v229_v20  ;;  %v232_v24 = vand.u32 2147483647, %v230_v1 }
  0xb3   :  { %v233_v25 = vadd.f32 %v231_v21, %v149_v18  ;;  %v234_v26 = vadd.f32 %v232_v24, %v150_v19 }
  0xb5   :  { %v248_v27 = vadd.f32 %v234_v26, %v233_v25 }
  0xb7   :  { %249 = vadd.xlane.f32.xlu0 %v248_v27 }
 0x144   :  { %v250_v28 = vpop.xlane.xlu0 %249 }
 0x145   :  { %v251_v29 = vrot.slane %v250_v28, 4 }
 0x147   :  { %v252_v14 = vadd.f32 %v251_v29, %v250_v28 }
 0x149   :  { %v253_v23 = vrot.slane %v252_v14, 2 }
 0x14b   :  { %v254_v30 = vadd.f32 %v253_v23, %v252_v14 }
 0x14d   :  { %v255_v31 = vrot.slane %v254_v30, 1 }
 0x14f   :  { %v256_v32 = vadd.f32 %v255_v31, %v254_v30 }
 0x151   :  { %285 = vpush %v256_v32 }
 0x182   :  { %s286_s7 = spop %285 }
 0x183   :  { %s258_s8 = smul.f32 0.00048828125, %s286_s7 }
 0x185   :  { %v259_v17 = vstv %s258_s8 }
 0x186   :  { %261 = vst [vmem:[#allocation10] sm:$0xff] %v259_v17 }
 0x187   :  { %350 = shalt.err (!%p347_p6)
}
 0x188   :  { %s351_s12 = scalar_lea.hbm %s465_s2, 128 }
 0x189   :  { %p352_p7 = scmp.ne.s32.totalorder %s465_s2, %s351_s12  ;;  %p355_p8 = scmp.lt.u32.totalorder %s351_s12, %s465_s2 }
 0x18b   :  { %p357_p9 = pnand %p355_p8, %p352_p7 }
 0x18d   :  { %360 = shalt.err (!%p357_p9)
}
 0x18e   :  { %271 = dma.vmem_to_hbm [thread:$0]  %s269_s6, 128, %s465_s2, [#allocation7]  }
 0x18f   :  { %365 = dma.done.wait [#allocation7], 128  }
 0x190   :  { %366 = vsyncadd [#allocation7], 4294967168 }
 0x191   :  { %275 = vsyncpa [#allocation6], 1 }
 0x192   :  { %276 = vsyncpa [#allocation9], 1 }
 0x193   :  { %277 = vsyncpa [#allocation7], 1 }

</bundles_post_ra>
